<compile_context>
chip_gen: v7x
topology: tpu7x:2x2x1
jax: 0.10.0
libtpu: 0.0.40
codegen_flags: <defaults>
</compile_context>

<pallas_src>
import functools

import jax
import jax.numpy as jnp
from jax.experimental import pallas as pl
from jax.experimental.pallas import tpu as pltpu


def _round_up(x: int, m: int) -> int:
    return (x + m - 1) // m * m


# ---- Kernel 1: 1x1 conv as MXU matmul + partial BatchNorm statistics ----------
def _conv_stats_kernel(x_ref, wc_ref, z_ref, st_ref, *, tb, n_valid):
    # x_ref: (TB, 9C); wc_ref: (9C, 9) block-structured conv weight.
    z = jnp.dot(x_ref[...], wc_ref[...], preferred_element_type=jnp.float32)  # (TB, 9)
    z_ref[...] = z

    # Partial BN stats (sum, sum-of-squares) over valid (un-padded) rows only.
    row = pl.program_id(0) * tb + jax.lax.broadcasted_iota(jnp.int32, z.shape, 0)
    zm = jnp.where(row < n_valid, z, 0.0)
    s = jnp.sum(zm)
    sq = jnp.sum(zm * zm)

    r = jax.lax.broadcasted_iota(jnp.int32, (8, 128), 0)
    c = jax.lax.broadcasted_iota(jnp.int32, (8, 128), 1)
    st_ref[...] = jnp.where((r == 0) & (c == 0), s,
                            jnp.where((r == 0) & (c == 1), sq, 0.0))


# ---- Kernel 2: folded BN + ReLU + fcl1 + ReLU + fcl2 + tanh -------------------
def _head_kernel(z_ref, scale_ref, shift_ref, w1_ref, b1_ref, w2_ref, b2_ref, o_ref):
    h = jnp.maximum(z_ref[...] * scale_ref[...] + shift_ref[...], 0.0)      # (TB, 9)
    h = jnp.dot(h, w1_ref[...], preferred_element_type=jnp.float32) + b1_ref[...]
    h = jnp.maximum(h, 0.0)                                                 # (TB, Hp)
    o = jnp.dot(h, w2_ref[...], preferred_element_type=jnp.float32) + b2_ref[...]
    o_ref[...] = jnp.tanh(o)                                                # (TB, 1)


def init_params(key, n_feature: int, hidden_layer: int):
    """Deterministic init mirroring torch defaults (uniform +/- 1/sqrt(fan_in))."""
    k_conv_w, k_conv_b, k_f1w, k_f1b, k_f2w, k_f2b = jax.random.split(key, 6)

    k = 1.0 / jnp.sqrt(jnp.float32(n_feature))
    conv_w = jax.random.uniform(k_conv_w, (n_feature,), jnp.float32, -k, k)
    conv_b = jax.random.uniform(k_conv_b, (), jnp.float32, -k, k)

    k1 = 1.0 / jnp.sqrt(jnp.float32(9))
    fcl1_w = jax.random.uniform(k_f1w, (hidden_layer, 9), jnp.float32, -k1, k1)
    fcl1_b = jax.random.uniform(k_f1b, (hidden_layer,), jnp.float32, -k1, k1)

    k2 = 1.0 / jnp.sqrt(jnp.float32(hidden_layer))
    fcl2_w = jax.random.uniform(k_f2w, (1, hidden_layer), jnp.float32, -k2, k2)
    fcl2_b = jax.random.uniform(k_f2b, (1,), jnp.float32, -k2, k2)

    return {
        "conv_w": conv_w, "conv_b": conv_b,
        "fcl1_w": fcl1_w, "fcl1_b": fcl1_b,
        "fcl2_w": fcl2_w, "fcl2_b": fcl2_b,
        "bn_gamma": jnp.float32(1.0), "bn_beta": jnp.float32(0.0),
        "bn_eps": jnp.float32(1e-5),
    }


def value_head_forward(x_nchw, params, *, block_b: int = 512):
    B, C, H, W = x_nchw.shape
    assert H == 3 and W == 3, "ValueHead requires 3x3 spatial (view(-1, 9))"
    F9 = H * W
    CF = C * F9

    # NCHW -> (B, 9C) is a free reshape (no transpose, no extra HBM round-trip).
    x2d = x_nchw.reshape(B, CF).astype(jnp.float32)

    # Batch tiling: TB rows per grid step (multiple of 8). Cap TB so the
    # double-buffered x tile stays <= ~8 MiB, well under the default scoped VMEM
    # on v5e/v6e/v7x even for large channel counts.
    TB = min(_round_up(B, 8), block_b)
    max_tb = max(8, ((8 << 20) // (CF * 4 * 2)) // 8 * 8)
    TB = min(TB, max_tb)
    Bp = _round_up(B, TB)
    nt = Bp // TB
    if Bp != B:
        x2d = jnp.pad(x2d, ((0, Bp - B), (0, 0)))

    # Block-structured 1x1-conv weight: Wconv[c*9+p, p] = conv_w[c].
    # (conv bias is omitted: it cancels exactly under training-mode BatchNorm.)
    eye9 = jnp.eye(F9, dtype=jnp.float32)
    wconv = (params["conv_w"].astype(jnp.float32)[:, None, None] * eye9[None]).reshape(CF, F9)

    # ---- Call 1: conv + per-tile partial BN stats -----------------------------
    z, stats = pl.pallas_call(
        functools.partial(_conv_stats_kernel, tb=TB, n_valid=B),
        grid=(nt,),
        in_specs=[
            pl.BlockSpec((TB, CF), lambda i: (i, 0)),
            pl.BlockSpec((CF, F9), lambda i: (0, 0)),
        ],
        out_specs=(
            pl.BlockSpec((TB, F9), lambda i: (i, 0)),
            pl.BlockSpec((8, 128), lambda i: (i, 0)),
        ),
        out_shape=(
            jax.ShapeDtypeStruct((Bp, F9), jnp.float32),
            jax.ShapeDtypeStruct((nt * 8, 128), jnp.float32),
        ),
        compiler_params=pltpu.CompilerParams(dimension_semantics=("parallel",)),
    )(x2d, wconv)

    # ---- Tiny scalar glue: finish BN stats, fold into scale/shift -------------
    p = stats.reshape(nt, 8, 128)
    total = jnp.sum(p[:, 0, 0])
    total_sq = jnp.sum(p[:, 0, 1])
    n = jnp.float32(B * F9)
    mean = total / n
    var = jnp.maximum(total_sq / n - mean * mean, 0.0)   # biased variance (training-mode BN)
    scale = params["bn_gamma"] * jax.lax.rsqrt(var + params["bn_eps"])
    shift = params["bn_beta"] - mean * scale
    scale9 = jnp.broadcast_to(scale.astype(jnp.float32), (1, F9))
    shift9 = jnp.broadcast_to(shift.astype(jnp.float32), (1, F9))

    # ---- Pad hidden dim to full 128-lane occupancy (zeros are exact no-ops) ----
    Hd = params["fcl1_w"].shape[0]
    Hp = _round_up(Hd, 128)
    w1p = jnp.zeros((F9, Hp), jnp.float32).at[:, :Hd].set(params["fcl1_w"].T)
    b1p = jnp.zeros((1, Hp), jnp.float32).at[:, :Hd].set(params["fcl1_b"][None, :])
    w2p = jnp.zeros((Hp, 1), jnp.float32).at[:Hd, :].set(params["fcl2_w"].T)
    b2 = params["fcl2_b"].reshape(1, 1).astype(jnp.float32)

    # ---- Call 2: BN apply + fcl1/relu + fcl2/tanh ------------------------------
    out = pl.pallas_call(
        _head_kernel,
        grid=(nt,),
        in_specs=[
            pl.BlockSpec((TB, F9), lambda i: (i, 0)),
            pl.BlockSpec((1, F9), lambda i: (0, 0)),
            pl.BlockSpec((1, F9), lambda i: (0, 0)),
            pl.BlockSpec((F9, Hp), lambda i: (0, 0)),
            pl.BlockSpec((1, Hp), lambda i: (0, 0)),
            pl.BlockSpec((Hp, 1), lambda i: (0, 0)),
            pl.BlockSpec((1, 1), lambda i: (0, 0)),
        ],
        out_specs=pl.BlockSpec((TB, 1), lambda i: (i, 0)),
        out_shape=jax.ShapeDtypeStruct((Bp, 1), jnp.float32),
        compiler_params=pltpu.CompilerParams(dimension_semantics=("parallel",)),
    )(z, scale9, shift9, w1p, b1p, w2p, b2)

    return out[:B]


def _reference_forward(x_nchw, params):
    """Pure-JAX reference matching the PyTorch forward (training-mode BN, with conv bias)."""
    B = x_nchw.shape[0]
    y = jnp.einsum("bchw,c->bhw", x_nchw, params["conv_w"]) + params["conv_b"]
    mean = jnp.mean(y)
    var = jnp.mean((y - mean) ** 2)
    s = (y - mean) * jax.lax.rsqrt(var + params["bn_eps"]) * params["bn_gamma"] + params["bn_beta"]
    h = jnp.maximum(s, 0.0).reshape(B, 9)
    h = jnp.maximum(h @ params["fcl1_w"].T + params["fcl1_b"], 0.0)
    return jnp.tanh(h @ params["fcl2_w"].T + params["fcl2_b"]).reshape(B, 1)


if __name__ == "__main__":
    fwd = jax.jit(value_head_forward, static_argnames=("block_b",))

    # --- Test 1: small canonical shape -----------------------------------------
    B, n_feature, hidden_layer = 2, 4, 32
    key = jax.random.PRNGKey(0)
    k_params, k_x, k_params2, k_x2 = jax.random.split(key, 4)
    params = init_params(k_params, n_feature, hidden_layer)
    x = jax.random.normal(k_x, (B, n_feature, 3, 3), jnp.float32)   # NCHW, as in PyTorch

    out = fwd(x, params)
    jax.block_until_ready(out)
    assert out.shape == (B, 1) and out.dtype == jnp.float32
    ref = _reference_forward(x, params)
    assert jnp.allclose(out, ref, atol=2e-2, rtol=2e-2), (out, ref)

    # --- Test 2: exercises batch padding + multi-tile grid + hidden padding -----
    B2, C2, H2 = 37, 8, 40
    params2 = init_params(k_params2, C2, H2)
    x2 = jax.random.normal(k_x2, (B2, C2, 3, 3), jnp.float32)
    out2 = fwd(x2, params2, block_b=16)          # TB=16 -> 3 tiles, padded batch
    jax.block_until_ready(out2)
    assert out2.shape == (B2, 1)
    ref2 = _reference_forward(x2, params2)
    assert jnp.allclose(out2, ref2, atol=2e-2, rtol=2e-2), (out2, ref2)

    print("KERNEL_OK")
</pallas_src>

<mosaic_0001>
module attributes {stable_mosaic.version = 11 : i64} {
  func.func @_conv_stats_kernel(%arg0: i32, %arg1: memref<8x36xf32, #tpu.memory_space<vmem>>, %arg2: memref<36x9xf32, #tpu.memory_space<vmem>>, %arg3: memref<8x9xf32, #tpu.memory_space<vmem>>, %arg4: memref<8x128xf32, #tpu.memory_space<vmem>>) attributes {dimension_semantics = [#tpu.dimension_semantics<parallel>], iteration_bounds = array<i64: 1>, scalar_prefetch = 0 : i64, scratch_operands = 0 : i64, tpu.core_type = #tpu.core_type<tc>, window_params = [{transform_indices = @transform_0, window_bounds = array<i64: 8, 36>}, {pipeline_mode = #tpu.pipeline_mode<synchronous>, transform_indices = @transform_1, window_bounds = array<i64: 36, 9>}, {transform_indices = @transform_2, window_bounds = array<i64: 8, 9>}, {transform_indices = @transform_3, window_bounds = array<i64: 8, 128>}]} {
    %c0 = arith.constant 0 : index
    %c0_0 = arith.constant 0 : index
    %0 = vector.load %arg1[%c0, %c0_0] : memref<8x36xf32, #tpu.memory_space<vmem>>, vector<8x36xf32>
    %c0_1 = arith.constant 0 : index
    %c0_2 = arith.constant 0 : index
    %1 = vector.load %arg2[%c0_1, %c0_2] : memref<36x9xf32, #tpu.memory_space<vmem>>, vector<36x9xf32>
    %cst = arith.constant dense<0.000000e+00> : vector<8x9xf32>
    %2 = tpu.matmul %0, %1, %cst {dimension_numbers = #tpu.dot_dimension_numbers<[1], [0], [0], [1], [0, 0, 1, 1], [], []>} : vector<8x36xf32>, vector<36x9xf32>, vector<8x9xf32> -> vector<8x9xf32>
    %c0_3 = arith.constant 0 : index
    %c0_4 = arith.constant 0 : index
    %3 = vector.load %arg3[%c0_3, %c0_4] : memref<8x9xf32, #tpu.memory_space<vmem>>, vector<8x9xf32>
    tpu.vector_store %arg3[%c0_3, %c0_4], %2 {strides = array<i32>} : memref<8x9xf32, #tpu.memory_space<vmem>>, vector<8x9xf32>,
    %c8_i32 = arith.constant 8 : i32
    %4 = arith.muli %arg0, %c8_i32 : i32
    %5 = tpu.iota {dimensions = array<i32: 0>} : vector<8x9xi32>
    %6 = vector.broadcast %4 : i32 to vector<8x9xi32>
    %7 = arith.addi %6, %5 : vector<8x9xi32>
    %c2_i32 = arith.constant 2 : i32
    %8 = vector.broadcast %c2_i32 : i32 to vector<8x9xi32>
    %9 = arith.cmpi slt, %7, %8 : vector<8x9xi32>
    %cst_5 = arith.constant 0.000000e+00 : f32
    %10 = vector.broadcast %cst_5 : f32 to vector<8x9xf32>
    %11 = arith.select %9, %2, %10 : vector<8x9xi1>, vector<8x9xf32>
    %12 = vector.shape_cast %11 : vector<8x9xf32> to vector<1x8x9xf32>
    %cst_6 = arith.constant dense<0.000000e+00> : vector<1xf32>
    %13 = vector.multi_reduction <add>, %12, %cst_6 [1, 2] : vector<1x8x9xf32> to vector<1xf32>
    %14 = vector.shape_cast %13 : vector<1xf32> to vector<1x1x1xf32>
    %15 = vector.extract %14[0, 0, 0] : f32 from vector<1x1x1xf32>
    %16 = arith.mulf %11, %11 : vector<8x9xf32>
    %17 = vector.shape_cast %16 : vector<8x9xf32> to vector<1x8x9xf32>
    %cst_7 = arith.constant dense<0.000000e+00> : vector<1xf32>
    %18 = vector.multi_reduction <add>, %17, %cst_7 [1, 2] : vector<1x8x9xf32> to vector<1xf32>
    %19 = vector.shape_cast %18 : vector<1xf32> to vector<1x1x1xf32>
    %20 = vector.extract %19[0, 0, 0] : f32 from vector<1x1x1xf32>
    %21 = tpu.iota {dimensions = array<i32: 0>} : vector<8x128xi32>
    %22 = tpu.iota {dimensions = array<i32: 1>} : vector<8x128xi32>
    %c0_i32 = arith.constant 0 : i32
    %23 = vector.broadcast %c0_i32 : i32 to vector<8x128xi32>
    %24 = arith.cmpi eq, %21, %23 : vector<8x128xi32>
    %c0_i32_8 = arith.constant 0 : i32
    %25 = vector.broadcast %c0_i32_8 : i32 to vector<8x128xi32>
    %26 = arith.cmpi eq, %22, %25 : vector<8x128xi32>
    %27 = arith.andi %24, %26 : vector<8x128xi1>
    %c0_i32_9 = arith.constant 0 : i32
    %28 = vector.broadcast %c0_i32_9 : i32 to vector<8x128xi32>
    %29 = arith.cmpi eq, %21, %28 : vector<8x128xi32>
    %c1_i32 = arith.constant 1 : i32
    %30 = vector.broadcast %c1_i32 : i32 to vector<8x128xi32>
    %31 = arith.cmpi eq, %22, %30 : vector<8x128xi32>
    %32 = arith.andi %29, %31 : vector<8x128xi1>
    %cst_10 = arith.constant 0.000000e+00 : f32
    %33 = vector.broadcast %20 : f32 to vector<8x128xf32>
    %34 = vector.broadcast %cst_10 : f32 to vector<8x128xf32>
    %35 = arith.select %32, %33, %34 : vector<8x128xi1>, vector<8x128xf32>
    %36 = vector.broadcast %15 : f32 to vector<8x128xf32>
    %37 = arith.select %27, %36, %35 : vector<8x128xi1>, vector<8x128xf32>
    %c0_11 = arith.constant 0 : index
    %c0_12 = arith.constant 0 : index
    %38 = vector.load %arg4[%c0_11, %c0_12] : memref<8x128xf32, #tpu.memory_space<vmem>>, vector<8x128xf32>
    tpu.vector_store %arg4[%c0_11, %c0_12], %37 {strides = array<i32>} : memref<8x128xf32, #tpu.memory_space<vmem>>, vector<8x128xf32>,
    return
  }
  func.func @transform_0(%arg0: i32) -> (i32, i32) {
    %c0_i32 = arith.constant 0 : i32
    %c0_i32_0 = arith.constant 0 : i32
    return %arg0, %c0_i32 : i32, i32
  }
  func.func @transform_1(%arg0: i32) -> (i32, i32) {
    %c0_i32 = arith.constant 0 : i32
    %c0_i32_0 = arith.constant 0 : i32
    %c0_i32_1 = arith.constant 0 : i32
    return %c0_i32, %c0_i32_0 : i32, i32
  }
  func.func @transform_2(%arg0: i32) -> (i32, i32) {
    %c0_i32 = arith.constant 0 : i32
    %c0_i32_0 = arith.constant 0 : i32
    return %arg0, %c0_i32 : i32, i32
  }
  func.func @transform_3(%arg0: i32) -> (i32, i32) {
    %c0_i32 = arith.constant 0 : i32
    %c0_i32_0 = arith.constant 0 : i32
    return %arg0, %c0_i32 : i32, i32
  }
}

module attributes {stable_mosaic.version = 11 : i64} {
  func.func @_head_kernel(%arg0: i32, %arg1: memref<8x9xf32, #tpu.memory_space<vmem>>, %arg2: memref<1x9xf32, #tpu.memory_space<vmem>>, %arg3: memref<1x9xf32, #tpu.memory_space<vmem>>, %arg4: memref<9x128xf32, #tpu.memory_space<vmem>>, %arg5: memref<1x128xf32, #tpu.memory_space<vmem>>, %arg6: memref<128x1xf32, #tpu.memory_space<vmem>>, %arg7: memref<1x1xf32, #tpu.memory_space<vmem>>, %arg8: memref<8x1xf32, #tpu.memory_space<vmem>>) attributes {dimension_semantics = [#tpu.dimension_semantics<parallel>], iteration_bounds = array<i64: 1>, scalar_prefetch = 0 : i64, scratch_operands = 0 : i64, tpu.core_type = #tpu.core_type<tc>, window_params = [{transform_indices = @transform_0, window_bounds = array<i64: 8, 9>}, {pipeline_mode = #tpu.pipeline_mode<synchronous>, transform_indices = @transform_1, window_bounds = array<i64: 1, 9>}, {pipeline_mode = #tpu.pipeline_mode<synchronous>, transform_indices = @transform_2, window_bounds = array<i64: 1, 9>}, {pipeline_mode = #tpu.pipeline_mode<synchronous>, transform_indices = @transform_3, window_bounds = array<i64: 9, 128>}, {pipeline_mode = #tpu.pipeline_mode<synchronous>, transform_indices = @transform_4, window_bounds = array<i64: 1, 128>}, {pipeline_mode = #tpu.pipeline_mode<synchronous>, transform_indices = @transform_5, window_bounds = array<i64: 128, 1>}, {pipeline_mode = #tpu.pipeline_mode<synchronous>, transform_indices = @transform_6, window_bounds = array<i64: 1, 1>}, {transform_indices = @transform_7, window_bounds = array<i64: 8, 1>}]} {
    %c0 = arith.constant 0 : index
    %c0_0 = arith.constant 0 : index
    %0 = vector.load %arg1[%c0, %c0_0] : memref<8x9xf32, #tpu.memory_space<vmem>>, vector<8x9xf32>
    %c0_1 = arith.constant 0 : index
    %c0_2 = arith.constant 0 : index
    %1 = vector.load %arg2[%c0_1, %c0_2] : memref<1x9xf32, #tpu.memory_space<vmem>>, vector<1x9xf32>
    %2 = vector.broadcast %1 : vector<1x9xf32> to vector<8x9xf32>
    %3 = arith.mulf %0, %2 : vector<8x9xf32>
    %c0_3 = arith.constant 0 : index
    %c0_4 = arith.constant 0 : index
    %4 = vector.load %arg3[%c0_3, %c0_4] : memref<1x9xf32, #tpu.memory_space<vmem>>, vector<1x9xf32>
    %5 = vector.broadcast %4 : vector<1x9xf32> to vector<8x9xf32>
    %6 = arith.addf %3, %5 : vector<8x9xf32>
    %cst = arith.constant 0.000000e+00 : f32
    %7 = vector.broadcast %cst : f32 to vector<8x9xf32>
    %8 = arith.maximumf %6, %7 : vector<8x9xf32>
    %c0_5 = arith.constant 0 : index
    %c0_6 = arith.constant 0 : index
    %9 = vector.load %arg4[%c0_5, %c0_6] : memref<9x128xf32, #tpu.memory_space<vmem>>, vector<9x128xf32>
    %cst_7 = arith.constant dense<0.000000e+00> : vector<8x128xf32>
    %10 = tpu.matmul %8, %9, %cst_7 {dimension_numbers = #tpu.dot_dimension_numbers<[1], [0], [0], [1], [0, 0, 1, 1], [], []>} : vector<8x9xf32>, vector<9x128xf32>, vector<8x128xf32> -> vector<8x128xf32>
    %c0_8 = arith.constant 0 : index
    %c0_9 = arith.constant 0 : index
    %11 = vector.load %arg5[%c0_8, %c0_9] : memref<1x128xf32, #tpu.memory_space<vmem>>, vector<1x128xf32>
    %12 = vector.broadcast %11 : vector<1x128xf32> to vector<8x128xf32>
    %13 = arith.addf %10, %12 : vector<8x128xf32>
    %cst_10 = arith.constant 0.000000e+00 : f32
    %14 = vector.broadcast %cst_10 : f32 to vector<8x128xf32>
    %15 = arith.maximumf %13, %14 : vector<8x128xf32>
    %c0_11 = arith.constant 0 : index
    %c0_12 = arith.constant 0 : index
    %16 = vector.load %arg6[%c0_11, %c0_12] : memref<128x1xf32, #tpu.memory_space<vmem>>, vector<128x1xf32>
    %cst_13 = arith.constant dense<0.000000e+00> : vector<8x1xf32>
    %17 = tpu.matmul %15, %16, %cst_13 {dimension_numbers = #tpu.dot_dimension_numbers<[1], [0], [0], [1], [0, 0, 1, 1], [], []>} : vector<8x128xf32>, vector<128x1xf32>, vector<8x1xf32> -> vector<8x1xf32>
    %c0_14 = arith.constant 0 : index
    %c0_15 = arith.constant 0 : index
    %18 = vector.load %arg7[%c0_14, %c0_15] : memref<1x1xf32, #tpu.memory_space<vmem>>, vector<1x1xf32>
    %19 = vector.broadcast %18 : vector<1x1xf32> to vector<8x1xf32>
    %20 = arith.addf %17, %19 : vector<8x1xf32>
    %21 = math.tanh %20 : vector<8x1xf32>
    %c0_16 = arith.constant 0 : index
    %c0_17 = arith.constant 0 : index
    %22 = vector.load %arg8[%c0_16, %c0_17] : memref<8x1xf32, #tpu.memory_space<vmem>>, vector<8x1xf32>
    tpu.vector_store %arg8[%c0_16, %c0_17], %21 {strides = array<i32>} : memref<8x1xf32, #tpu.memory_space<vmem>>, vector<8x1xf32>,
    return
  }
  func.func @transform_0(%arg0: i32) -> (i32, i32) {
    %c0_i32 = arith.constant 0 : i32
    %c0_i32_0 = arith.constant 0 : i32
    return %arg0, %c0_i32 : i32, i32
  }
  func.func @transform_1(%arg0: i32) -> (i32, i32) {
    %c0_i32 = arith.constant 0 : i32
    %c0_i32_0 = arith.constant 0 : i32
    %c0_i32_1 = arith.constant 0 : i32
    return %c0_i32, %c0_i32_0 : i32, i32
  }
  func.func @transform_2(%arg0: i32) -> (i32, i32) {
    %c0_i32 = arith.constant 0 : i32
    %c0_i32_0 = arith.constant 0 : i32
    %c0_i32_1 = arith.constant 0 : i32
    return %c0_i32, %c0_i32_0 : i32, i32
  }
  func.func @transform_3(%arg0: i32) -> (i32, i32) {
    %c0_i32 = arith.constant 0 : i32
    %c0_i32_0 = arith.constant 0 : i32
    %c0_i32_1 = arith.constant 0 : i32
    return %c0_i32, %c0_i32_0 : i32, i32
  }
  func.func @transform_4(%arg0: i32) -> (i32, i32) {
    %c0_i32 = arith.constant 0 : i32
    %c0_i32_0 = arith.constant 0 : i32
    %c0_i32_1 = arith.constant 0 : i32
    return %c0_i32, %c0_i32_0 : i32, i32
  }
  func.func @transform_5(%arg0: i32) -> (i32, i32) {
    %c0_i32 = arith.constant 0 : i32
    %c0_i32_0 = arith.constant 0 : i32
    %c0_i32_1 = arith.constant 0 : i32
    return %c0_i32, %c0_i32_0 : i32, i32
  }
  func.func @transform_6(%arg0: i32) -> (i32, i32) {
    %c0_i32 = arith.constant 0 : i32
    %c0_i32_0 = arith.constant 0 : i32
    %c0_i32_1 = arith.constant 0 : i32
    return %c0_i32, %c0_i32_0 : i32, i32
  }
  func.func @transform_7(%arg0: i32) -> (i32, i32) {
    %c0_i32 = arith.constant 0 : i32
    %c0_i32_0 = arith.constant 0 : i32
    return %arg0, %c0_i32 : i32, i32
  }
}

</mosaic_0001>

<bundles_post_ra>
// kernel: value_head_forward.3
= control target key start
LH: loop header
LB: loop body
LE: loop exit
PB: predicated region body
PF: predicated region fallthrough
CT: control target
= control target key end

     0   :  { %vm59_vm0 = vcmask 1040384   ;;  %v336_v0 = vmov 0.0|0.0   ;;  %vm337_vm1 = vmmov 1   ;;  %vm338_vm3 = vmmov 0   ;;  %s452_s3 = inlined_call_operand.vmem [shape: f32[9,128], index: 3, kind: input, shape index: {}]   ;;  %s453_s0 = inlined_call_operand.vmem [shape: f32[8,9], index: 0, kind: input, shape index: {}]   ;;  %s454_s1 = inlined_call_operand.vmem [shape: f32[1,9], index: 1, kind: input, shape index: {}]   ;;  %s455_s2 = inlined_call_operand.vmem [shape: f32[1,9], index: 2, kind: input, shape index: {}]   ;;  %s456_s5 = inlined_call_operand.vmem [shape: f32[128,1], index: 5, kind: input, shape index: {}]   ;;  %s457_s6 = inlined_call_operand.<no memory space> [shape: f32[1,1], index: 6, kind: input, shape index: {}]   ;;  %s458_s4 = inlined_call_operand.vmem [shape: f32[1,128], index: 4, kind: input, shape index: {}]   ;;  %s459_s7 = inlined_call_operand.vmem [shape: f32[8,1], index: 7, kind: output, shape index: {}]  }
   0x1   :  { %302 = vmatprep.subr.bf16.mxu0 %v336_v0  ;;  %v46_v1 = vld [vmem:[%s452_s3] sm:$0xff]  ;;  %v47_v2 = vld [vmem:[%s452_s3 + $0x8] sm:$0x1]  ;;  %vm304_vm2 = vmpackc.low %vm59_vm0, %vm337_vm1  ;;  %306 = vmatprep.subr.bf16.mxu1 %v336_v0  ;;  %v339_v4 = vmov 0.0   ;;  %vm55_vm4 = vcmask 72704   ;;  %v12_v35 = vstv %s457_s6  ;;  %vm228_vm5 = vcmask 7168  }
   0x2   :  { %v303_v3 = vpack.c.bf16 %v47_v2, %v46_v1  ;;  %264 = vmatprep.mubr.msk.f32.mxu0 %vm338_vm3, %v339_v4  ;;  %v28_v5 = vld [vmem:[%s453_s0] sm:$0xff]  ;;  %299 = vmatprep.mubr.msk.f32.mxu1 %vm338_vm3, %v339_v4  ;;  %v135_v10 = vld [vmem:[%s456_s5 + $0x8] sm:$0xff]  ;;  %v136_v11 = vld [vmem:[%s456_s5 + $0x10] sm:$0xff]  ;;  %13 = vst [vmem:[#allocation2] sm:$0x1] %v12_v35 }
   0x3   :  { %v234_v6 = vld [vmem:[%s454_s1] ss:$0 sm:$0xff]  ;;  %v137_v13 = vld [vmem:[%s456_s5 + $0x18] sm:$0xff]  ;;  %v139_v18 = vld [vmem:[%s456_s5 + $0x28] sm:$0xff] }
   0x4   :  { %v235_v7 = vld [vmem:[%s455_s2] ss:$0 sm:$0xff]  ;;  %v36_v8 = vmul.f32 %v234_v6, %v28_v5  ;;  %305 = vmatpush3.bf16.msk.msra.mxu0 %vm304_vm2, %v303_v3  ;;  %v310_v15 = vpack.c.bf16 %v137_v13, %v136_v11  ;;  %v140_v20 = vld [vmem:[%s456_s5 + $0x30] sm:$0xff]  ;;  %v141_v21 = vld [vmem:[%s456_s5 + $0x38] sm:$0xff] }
   0x5   :  { %v134_v9 = vld [vmem:[%s456_s5] sm:$0xff]  ;;  %v316_v22 = vpack.c.bf16 %v141_v21, %v140_v20  ;;  %v143_v24 = vld [vmem:[%s456_s5 + $0x48] sm:$0xff]  ;;  %v144_v26 = vld [vmem:[%s456_s5 + $0x50] sm:$0xff] }
   0x6   :  { %v307_v12 = vpack.c.bf16 %v135_v10, %v134_v9  ;;  %v44_v14 = vadd.f32 %v235_v7, %v36_v8  ;;  %v138_v17 = vld [vmem:[%s456_s5 + $0x20] sm:$0xff]  ;;  %v145_v27 = vld [vmem:[%s456_s5 + $0x58] sm:$0xff]  ;;  %v147_v30 = vld [vmem:[%s456_s5 + $0x68] sm:$0xff] }
   0x7   :  { %v313_v19 = vpack.c.bf16 %v139_v18, %v138_v17  ;;  %v142_v23 = vld [vmem:[%s456_s5 + $0x40] sm:$0xff]  ;;  %v322_v28 = vpack.c.bf16 %v145_v27, %v144_v26  ;;  %v148_v32 = vld [vmem:[%s456_s5 + $0x70] sm:$0xff]  ;;  %v149_v33 = vld [vmem:[%s456_s5 + $0x78] sm:$0xff] }
   0x8   :  { %308 = vmatpush3.bf16.msra.mxu1 %v307_v12  ;;  %v45_v16 = vmax.f32 %v44_v14, 0.0  ;;  %v319_v25 = vpack.c.bf16 %v143_v24, %v142_v23  ;;  %v146_v29 = vld [vmem:[%s456_s5 + $0x60] sm:$0xff]  ;;  %v328_v34 = vpack.c.bf16 %v149_v33, %v148_v32 }
   0x9   :  { %309 = vmatprep.subr.bf16.mxu1 %v336_v0  ;;  %v325_v31 = vpack.c.bf16 %v147_v30, %v146_v29  ;;  %v236_v36 = vld [vmem:[%s458_s4] ss:$0 sm:$0xff] }
   0xa   :  { %265 = vmatmul.mubr.msk.f32.vlgmr.msra.gmra.mrb[0].mxu0 %vm55_vm4, %v45_v16  ;;  %v239_v41 = vld [vmem:[#allocation2] ss:$0 sm:$0xff] }
   0xc   :  { %311 = vmatpush3.bf16.msra.mxu1 %v310_v15 }
   0xd   :  { %312 = vmatprep.subr.bf16.mxu1 %v336_v0 }
  0x10   :  { %314 = vmatpush3.bf16.msra.mxu1 %v313_v19 }
  0x11   :  { %315 = vmatprep.subr.bf16.mxu1 %v336_v0 }
  0x14   :  { %317 = vmatpush3.bf16.msra.mxu1 %v316_v22 }
  0x15   :  { %318 = vmatprep.subr.bf16.mxu1 %v336_v0 }
  0x18   :  { %320 = vmatpush3.bf16.msra.mxu1 %v319_v25 }
  0x19   :  { %321 = vmatprep.subr.bf16.mxu1 %v336_v0 }
  0x1c   :  { %323 = vmatpush3.bf16.msra.mxu1 %v322_v28 }
  0x1d   :  { %324 = vmatprep.subr.bf16.mxu1 %v336_v0 }
  0x20   :  { %326 = vmatpush3.bf16.msra.mxu1 %v325_v31 }
  0x21   :  { %327 = vmatprep.subr.bf16.mxu1 %v336_v0 }
  0x24   :  { %329 = vmatpush3.bf16.msra.mxu1 %v328_v34 }
  0xdd   :  { %v129_v37 = vpop.f32.mrb[0].mxu0 }
  0xde   :  { %v130_v38 = vadd.f32 %v236_v36, %v129_v37  ;;  %v266_v39 = vpop.f32.mrb[1].mxu0 }
  0xe0   :  { %v133_v40 = vmax.f32 %v130_v38, 0.0 }
  0xe2   :  { %300 = vmatmul.mubr.f32.vlgmr.msra.gmra.mrb[0].mxu1 %v133_v40 }
 0x1b5   :  { %v223_v42 = vpop.f32.mrb[0].mxu1 }
 0x1b6   :  { %v224_v43 = vadd.f32 %v239_v41, %v223_v42  ;;  %v301_v44 = vpop.f32.mrb[1].mxu1 }
 0x1b8   :  { %334 = vtanh.f32 %v224_v43 }
 0x1c2   :  { %v335_v45 = vpop.eup %334 }
 0x1c3   :  { %229 = vst.msk [vmem:[%s459_s7] sm:$0xff] %vm228_vm5, %v335_v45 }

// kernel: value_head_forward.2
= control target key start
LH: loop header
LB: loop body
LE: loop exit
PB: predicated region body
PF: predicated region fallthrough
CT: control target
= control target key end

     0   :  { %v181_v0 = vmov 0.0|0.0   ;;  %vm182_vm0 = vmmov 0   ;;  %v183_v4 = vmov 0.0   ;;  %vm23_vm1 = vcmask 1043456   ;;  %s228_s1 = inlined_call_operand.vmem [shape: f32[36,9], index: 1, kind: input, shape index: {}]   ;;  %s229_s0 = inlined_call_operand.vmem [shape: f32[8,36], index: 0, kind: input, shape index: {}]   ;;  %s230_s2 = inlined_call_operand.vmem [shape: f32[8,9], index: 2, kind: output, shape index: {0}]   ;;  %s231_s3 = inlined_call_operand.vmem [shape: f32[8,128], index: 3, kind: output, shape index: {1}]  }
   0x1   :  { %168 = vmatprep.subr.bf16.mxu0 %v181_v0  ;;  %v14_v1 = vld [vmem:[%s228_s1] sm:$0xff]  ;;  %v15_v2 = vld [vmem:[%s228_s1 + $0x8] sm:$0xff]  ;;  %v16_v3 = vld [vmem:[%s228_s1 + $0x10] sm:$0xff]  ;;  %165 = vmatprep.mubr.msk.f32.mxu0 %vm182_vm0, %v183_v4  ;;  %vm19_vm2 = vcmask 293888   ;;  %v100_v10 = vlaneseq  ;;  %vm97_vm3 = vcmask 72704  }
   0x2   :  { %v169_v5 = vpack.c.bf16 %v15_v2, %v14_v1  ;;  %v17_v6 = vld [vmem:[%s228_s1 + $0x18] sm:$0xff]  ;;  %v18_v8 = vld [vmem:[%s228_s1 + $0x20] sm:$0xf] }
   0x3   :  { %v172_v7 = vpack.c.bf16 %v17_v6, %v16_v3  ;;  %v13_v9 = vld [vmem:[%s229_s0] sm:$0xff]  ;;  %v101_v11 = vshrl.u32 %v100_v10, 7  ;;  %v128_v32 = vand.u32 127, %v100_v10 }
   0x4   :  { %170 = vmatpush3.bf16.msra.mxu0 %v169_v5 }
   0x5   :  { %171 = vmatprep.subr.bf16.mxu0 %v181_v0  ;;  %vm104_vm4 = vcmp.lt.s32.totalorder %v101_v11, 2  ;;  %vm129_vm5 = vcmp.eq.s32.totalorder %v101_v11, 0  ;;  %vm132_vm6 = vcmp.eq.s32.totalorder %v128_v32, 1  ;;  %vm130_vm7 = vcmp.eq.s32.totalorder %v128_v32, 0 }
   0x6   :  { %vm133_vm8 = vmand %vm129_vm5, %vm132_vm6 }
   0x7   :  { %vm131_vm9 = vmand %vm129_vm5, %vm130_vm7 }
   0x8   :  { %173 = vmatpush3.bf16.msra.mxu0 %v172_v7 }
   0x9   :  { %163 = vmatprep.subr.mxu0 %v183_v4 }
   0xc   :  { %164 = vmatpush3.msk.msra.mxu0 %vm23_vm1, %v18_v8 }
   0xd   :  { %166 = vmatmul.mubr.msk.f32.vlgmr.msra.gmra.mrb[0].mxu0 %vm19_vm2, %v13_v9 }
  0xe0   :  { %v93_v12 = vpop.f32.mrb[0].mxu0 }
  0xe1   :  { %98 = vst.msk [vmem:[%s230_s2] sm:$0xff] %vm97_vm3, %v93_v12  ;;  %v167_v13 = vpop.f32.mrb[1].mxu0  ;;  %v105_v14 = vsel %vm104_vm4, %v93_v12, 0.0 }
  0xe2   :  { %v106_v15 = vsel %vm97_vm3, %v105_v14, 0.0  ;;  %v116_v16 = vmul.f32 %v105_v14, %v105_v14 }
  0xe3   :  { %107 = vadd.xlane.f32.xlu0 %v106_v15 }
  0xe4   :  { %v117_v17 = vsel %vm97_vm3, %v116_v16, 0.0 }
  0xe7   :  { %118 = vadd.xlane.f32.xlu0 %v117_v17 }
 0x170   :  { %v108_v18 = vpop.xlane.xlu0 %107 }
 0x171   :  { %v109_v19 = vrot.slane %v108_v18, 4 }
 0x173   :  { %v110_v20 = vadd.f32 %v109_v19, %v108_v18 }
 0x174   :  { %v119_v21 = vpop.xlane.xlu0 %118 }
 0x175   :  { %v111_v22 = vrot.slane %v110_v20, 2  ;;  %v120_v23 = vrot.slane %v119_v21, 4 }
 0x177   :  { %v121_v24 = vadd.f32 %v120_v23, %v119_v21  ;;  %v112_v25 = vadd.f32 %v111_v22, %v110_v20 }
 0x179   :  { %v122_v26 = vrot.slane %v121_v24, 2  ;;  %v113_v27 = vrot.slane %v112_v25, 1 }
 0x17b   :  { %v123_v28 = vadd.f32 %v122_v26, %v121_v24  ;;  %v114_v29 = vadd.f32 %v113_v27, %v112_v25 }
 0x17d   :  { %174 = vpush %v114_v29  ;;  %v124_v30 = vrot.slane %v123_v28, 1 }
 0x17f   :  { %v125_v31 = vadd.f32 %v124_v30, %v123_v28 }
 0x181   :  { %176 = vpush %v125_v31 }
 0x1ae   :  { %s175_s0 = spop %174 }
 0x1af   :  { %v136_v34 = vstv %s175_s0 }
 0x1b2   :  { %s177_s1 = spop %176 }
 0x1b3   :  { %v134_v33 = vstv %s177_s1 }
 0x1b4   :  { %v135_v35 = vsel %vm133_vm8, %v134_v33, 0.0 }
 0x1b5   :  { %v137_v36 = vsel %vm131_vm9, %v136_v34, %v135_v35 }
 0x1b6   :  { %138 = vst [vmem:[%s231_s3] sm:$0xff] %v137_v36 }

</bundles_post_ra>
